<compile_context>
chip_gen: v6e
topology: v6e:2x2x1
jax: 0.10.0
libtpu: 0.0.40
codegen_flags: <defaults>
</compile_context>

<pallas_src>
import functools

import numpy as np

import jax
import jax.numpy as jnp
from jax import lax
from jax.experimental import pallas as pl
from jax.experimental.pallas import tpu as pltpu


def _round_up(v, m):
    return ((v + m - 1) // m) * m


# ------------------------------ fused kernel ---------------------------------

def _fullmodel_kernel(flags_ref, x_ref, t_ref, cb_ref, pr_ref, pf_ref,
                      fb_ref, yw_ref, yb_ref, lat_ref, c_ref, y_ref,
                      *, K, R_out):
    """Fused FullModel forward.

    flags_ref : SMEM (2,) int32       [use_latents, hard_cbm]
    x_ref     : (B*Hp, slot)    f32   padded channels-last input (slot=Wp2*Cin)
    t_ref     : (K*slot, W*Cout) bf16 fused Toeplitz conv weight
    cb_ref    : (1, W*Cout)     f32   conv bias tiled over W
    pr_ref    : (Bp, R_out)     bf16  row-pool matrix (1/H at valid rows)
    pf_ref    : (W*Cout, Np)    bf16  column-pool (1/W) fused with FC weight
    fb_ref    : (1, Np)         f32   FC bias (zero padded to 128 lanes)
    yw_ref    : (Np, Yp)        bf16  c->y weight (zero padded)
    yb_ref    : (1, Yp)         f32   c->y bias (zero padded)
    lat_ref   : (1, Np)         f32   1.0 on latent lanes (lane >= c_num)
    c_ref     : (Bp, Np)        f32   concept/latent activations (padded)
    y_ref     : (Bp, Yp)        f32   class scores (padded)
    """
    ul = (flags_ref[0] != 0).astype(jnp.float32)   # scalar 0.0 / 1.0
    hc = (flags_ref[1] != 0).astype(jnp.float32)

    # Build X_cat = [shift_0 | shift_1 | shift_2] from static row slices of
    # the padded channels-last input; each slot is a full 128-lane block, so
    # the lane concatenation is aligned.  One 384-deep MXU matmul then
    # computes the whole 3x3 conv.
    pieces = [x_ref[pl.ds(ki, R_out), :] for ki in range(K)]
    x_cat = jnp.concatenate(pieces, axis=1).astype(jnp.bfloat16)
    conv = jnp.dot(x_cat, t_ref[...], preferred_element_type=jnp.float32)
    conv = jnp.maximum(conv + cb_ref[...], 0.0)    # (R_out, W*Cout) post-ReLU

    # Global average pool + FC folded into two matmuls:
    #   logits = P_row @ relu(conv) @ (P_col @ fc_w) + fc_b
    row_sum = jnp.dot(pr_ref[...], conv.astype(jnp.bfloat16),
                      preferred_element_type=jnp.float32)
    logits = jnp.dot(row_sum.astype(jnp.bfloat16), pf_ref[...],
                     preferred_element_type=jnp.float32) + fb_ref[...]
    c_raw = jax.nn.sigmoid(logits)                 # (Bp, Np), f32

    # Concept-bottleneck mask / hard-CBM rounding, gated by runtime flags.
    lat = lat_ref[...]                             # 1.0 on latent lanes
    # torch.round of a sigmoid output in [0, 1] is exactly a 0.5 threshold
    # (ties at 0.5 round to the even value 0), so use compare+select in f32.
    c_round = (c_raw > 0.5).astype(jnp.float32)
    c_masked = c_raw * (1.0 - lat)                 # latents zeroed
    # Returned concepts: raw if use_latents else masked.
    c_out = ul * c_raw + (1.0 - ul) * c_masked
    # Hard-CBM input: concepts rounded; latents raw if use_latents else 0.
    c_hard = lat * (ul * c_raw) + (1.0 - lat) * c_round
    # y input: hard if hard_cbm else c_out.
    y_in = hc * c_hard + (1.0 - hc) * c_out

    c_ref[...] = c_out
    y_ref[...] = jnp.dot(y_in.astype(jnp.bfloat16), yw_ref[...],
                         preferred_element_type=jnp.float32) + yb_ref[...]


# ------------------------------ model wrapper --------------------------------

class FullModelPallas:
    """JAX/Pallas re-implementation of FullModel.forward (single fused kernel).

    Parameters use PyTorch layouts:
      conv_w (Cout, Cin, K, K), conv_b (Cout,)
      fc_w   (2*c_num, Cout),   fc_b   (2*c_num,)
      y_w    (num_classes, 2*c_num), y_b (num_classes,)
    """

    def __init__(self, params, c_num, input_shape):
        B, Cin, H, W = input_shape
        conv_w = np.asarray(params["conv_w"], np.float32)
        conv_b = np.asarray(params["conv_b"], np.float32)
        fc_w = np.asarray(params["fc_w"], np.float32)
        fc_b = np.asarray(params["fc_b"], np.float32)
        y_w = np.asarray(params["y_w"], np.float32)
        y_b = np.asarray(params["y_b"], np.float32)

        Cout, Cin_w, K, _ = conv_w.shape
        assert Cin_w == Cin
        n_out = fc_w.shape[0]
        num_classes = y_w.shape[0]
        assert n_out == 2 * c_num

        pad = K // 2
        Hp, Wp = H + 2 * pad, W + 2 * pad
        # Extend the right-side width padding so that each shifted-view lane
        # slot (Wp2*Cin) is a multiple of 128 -> aligned lane concatenation
        # inside the kernel.  Falls back to the exact size if Cin does not
        # divide the rounded value (still correct, just unaligned).
        slot = _round_up(Wp * Cin, 128)
        if slot % Cin:
            slot = Wp * Cin
        Wp2 = slot // Cin
        BHp = B * Hp
        R_out = BHp - 2 * pad              # conv rows computed in-kernel
        WCout = W * Cout
        Bp = _round_up(max(B, 8), 8)       # sublane-padded output rows
        Np = _round_up(n_out, 128)         # lane-padded concept dim
        Yp = _round_up(num_classes, 128)   # lane-padded class dim

        # ---- init-time precompute of all layout transforms ----
        # Fused Toeplitz conv weight: column (w*Cout+co) of output row r picks
        # x2d[r+ki, wp*Cin+ci] * conv_w[co, ci, ki, wp-w].
        T_cat = np.zeros((K * slot, WCout), np.float32)
        for ki in range(K):
            for kj in range(K):
                blk = conv_w[:, :, ki, kj].T                 # (Cin, Cout)
                for w in range(W):
                    wp = w + kj
                    r0 = ki * slot + wp * Cin
                    T_cat[r0:r0 + Cin, w * Cout:(w + 1) * Cout] = blk

        cb_row = np.tile(conv_b, W).reshape(1, WCout)

        # Row pool (1/H) over the valid conv rows r = b*Hp + h, h in [0, H).
        P_row = np.zeros((Bp, R_out), np.float32)
        for b in range(B):
            P_row[b, b * Hp:b * Hp + H] = 1.0 / H
        # Column pool (1/W) fused with the FC weight.
        PF = np.zeros((WCout, Np), np.float32)
        PF[:, :n_out] = np.tile(fc_w.T, (W, 1)) / W          # (W*Cout, n_out)

        fb_pad = np.zeros((1, Np), np.float32)
        fb_pad[0, :n_out] = fc_b
        yw_pad = np.zeros((Np, Yp), np.float32)
        yw_pad[:n_out, :num_classes] = y_w.T
        yb_pad = np.zeros((1, Yp), np.float32)
        yb_pad[0, :num_classes] = y_b
        lat_mask = (np.arange(Np) >= c_num).astype(np.float32).reshape(1, Np)

        consts = (
            jnp.asarray(T_cat, jnp.bfloat16),
            jnp.asarray(cb_row, jnp.float32),
            jnp.asarray(P_row, jnp.bfloat16),
            jnp.asarray(PF, jnp.bfloat16),
            jnp.asarray(fb_pad, jnp.float32),
            jnp.asarray(yw_pad, jnp.bfloat16),
            jnp.asarray(yb_pad, jnp.float32),
            jnp.asarray(lat_mask, jnp.float32),
        )

        kernel = functools.partial(_fullmodel_kernel, K=K, R_out=R_out)

        cost = pl.CostEstimate(
            flops=2 * (R_out * (K * slot) * WCout + Bp * R_out * WCout
                       + Bp * WCout * Np + Bp * Np * Yp),
            transcendentals=Bp * Np,
            bytes_accessed=(BHp * slot * 4 + K * slot * WCout * 2
                            + WCout * 4 + Bp * R_out * 2 + WCout * Np * 2
                            + Np * 4 + Np * Yp * 2 + Yp * 4 + Np * 4 + 8
                            + Bp * (Np + Yp) * 4),
        )

        def forward(x, flags):
            # Single fused pad + transpose + reshape copy (layout-only ops; the
            # extra right-side W padding makes the lane slot exactly `slot`).
            xp = jnp.pad(x, ((0, 0), (0, 0), (pad, pad), (pad, Wp2 - W - pad)))
            x2d = xp.transpose(0, 2, 3, 1).reshape(BHp, slot)
            c_full, y_full = pl.pallas_call(
                kernel,
                out_shape=(jax.ShapeDtypeStruct((Bp, Np), jnp.float32),
                           jax.ShapeDtypeStruct((Bp, Yp), jnp.float32)),
                in_specs=[
                    pl.BlockSpec(memory_space=pltpu.MemorySpace.SMEM),  # flags
                    pl.BlockSpec((BHp, slot), lambda: (0, 0)),
                    pl.BlockSpec((K * slot, WCout), lambda: (0, 0)),
                    pl.BlockSpec((1, WCout), lambda: (0, 0)),
                    pl.BlockSpec((Bp, R_out), lambda: (0, 0)),
                    pl.BlockSpec((WCout, Np), lambda: (0, 0)),
                    pl.BlockSpec((1, Np), lambda: (0, 0)),
                    pl.BlockSpec((Np, Yp), lambda: (0, 0)),
                    pl.BlockSpec((1, Yp), lambda: (0, 0)),
                    pl.BlockSpec((1, Np), lambda: (0, 0)),
                ],
                out_specs=(pl.BlockSpec((Bp, Np), lambda: (0, 0)),
                           pl.BlockSpec((Bp, Yp), lambda: (0, 0))),
                cost_estimate=cost,
            )(flags, x2d, *consts)
            return c_full[:B, :n_out], y_full[:B, :num_classes]

        self._forward = jax.jit(forward)
        self.c_num = c_num
        self.l_num = c_num
        self.num_classes = num_classes
        self.n_out = n_out
        # int32 (avoid int64 on TPU); kept for interface parity with PyTorch.
        self.ixs = jnp.arange(2 * c_num, dtype=jnp.int32)

    def __call__(self, x, use_latents=True, hard_cbm=False):
        flags = jnp.array([int(bool(use_latents)), int(bool(hard_cbm))],
                          dtype=jnp.int32)
        return self._forward(x, flags)


# ----------------------------- pure-JAX reference ----------------------------

def reference_forward(params, x, c_num, use_latents=True, hard_cbm=False):
    conv = lax.conv_general_dilated(
        x, params["conv_w"], window_strides=(1, 1), padding="SAME",
        dimension_numbers=("NCHW", "OIHW", "NCHW"))
    conv = jnp.maximum(conv + params["conv_b"][None, :, None, None], 0.0)
    pooled = jnp.mean(conv, axis=(2, 3))
    c = jax.nn.sigmoid(pooled @ params["fc_w"].T + params["fc_b"])
    ixs = jnp.arange(2 * c_num, dtype=jnp.int32)
    mask = ixs[None, :] >= c_num
    c_hard = None
    if not use_latents:
        if hard_cbm:
            c_hard = jnp.where(mask, 0.0, jnp.round(c))
        c = jnp.where(mask, 0.0, c)
    elif hard_cbm:
        c_hard = jnp.where(mask, c, jnp.round(c))
    y = (c if not hard_cbm else c_hard) @ params["y_w"].T + params["y_b"]
    return c, y


def reference_head(c_out, params, c_num, use_latents, hard_cbm):
    """c->y head recomputed from the kernel's own c output (numpy, f32)."""
    c_out = np.asarray(c_out, np.float32)
    ixs = np.arange(c_out.shape[1], dtype=np.int32)
    mask = ixs[None, :] >= c_num
    if hard_cbm:
        rounded = (c_out > 0.5).astype(np.float32)
        if use_latents:
            y_in = np.where(mask, c_out, rounded)
        else:
            y_in = np.where(mask, 0.0, rounded)
    else:
        y_in = c_out  # already masked by the kernel when use_latents=False
    return (y_in @ np.asarray(params["y_w"], np.float32).T
            + np.asarray(params["y_b"], np.float32))


# --------------------------------- main ---------------------------------------

if __name__ == "__main__":
    B, Cin, H, W = 2, 4, 16, 16
    Cout, K = 8, 3
    c_num = 6
    n_out = 2 * c_num
    num_classes = 5

    key = jax.random.PRNGKey(0)
    ks = jax.random.split(key, 7)
    params = {
        "conv_w": 0.3 * jax.random.normal(ks[0], (Cout, Cin, K, K), jnp.float32),
        "conv_b": 0.1 * jax.random.normal(ks[1], (Cout,), jnp.float32),
        "fc_w":   0.3 * jax.random.normal(ks[2], (n_out, Cout), jnp.float32),
        "fc_b":   0.1 * jax.random.normal(ks[3], (n_out,), jnp.float32),
        "y_w":    0.3 * jax.random.normal(ks[4], (num_classes, n_out), jnp.float32),
        "y_b":    0.1 * jax.random.normal(ks[5], (num_classes,), jnp.float32),
    }
    x = jax.random.normal(ks[6], (B, Cin, H, W), jnp.float32)

    model = FullModelPallas(params, c_num=c_num, input_shape=(B, Cin, H, W))

    # Default forward path (use_latents=True, hard_cbm=False).
    c_out, y_out = model(x)
    jax.block_until_ready((c_out, y_out))
    assert c_out.shape == (B, n_out) and y_out.shape == (B, num_classes)

    # All four flag combinations reuse the SAME compiled kernel (runtime SMEM
    # flags); check against a pure-JAX f32 reference (bf16 MXU inputs keep us
    # well inside the 2e-2 tolerance).
    for ul in (True, False):
        for hc in (False, True):
            c_k, y_k = model(x, use_latents=ul, hard_cbm=hc)
            c_r, y_r = reference_forward(params, x, c_num, ul, hc)
            jax.block_until_ready((c_k, y_k, c_r, y_r))
            np.testing.assert_allclose(np.asarray(c_k), np.asarray(c_r),
                                       rtol=2e-2, atol=2e-2)
            # y head + flag logic checked from the kernel's own c output to
            # avoid spurious mismatches if a sigmoid value sits within float
            # error of the 0.5 rounding threshold.
            y_chk = reference_head(c_k, params, c_num, ul, hc)
            np.testing.assert_allclose(np.asarray(y_k), y_chk,
                                       rtol=2e-2, atol=2e-2)
            if not hc:
                np.testing.assert_allclose(np.asarray(y_k), np.asarray(y_r),
                                           rtol=2e-2, atol=2e-2)

    print("KERNEL_OK")
</pallas_src>

<mosaic_0001>
module attributes {stable_mosaic.version = 11 : i64} {
  func.func @_fullmodel_kernel(%arg0: memref<2xi32, #tpu.memory_space<smem>>, %arg1: memref<36x128xf32, #tpu.memory_space<vmem>>, %arg2: memref<384x128xbf16, #tpu.memory_space<vmem>>, %arg3: memref<1x128xf32, #tpu.memory_space<vmem>>, %arg4: memref<8x34xbf16, #tpu.memory_space<vmem>>, %arg5: memref<128x128xbf16, #tpu.memory_space<vmem>>, %arg6: memref<1x128xf32, #tpu.memory_space<vmem>>, %arg7: memref<128x128xbf16, #tpu.memory_space<vmem>>, %arg8: memref<1x128xf32, #tpu.memory_space<vmem>>, %arg9: memref<1x128xf32, #tpu.memory_space<vmem>>, %arg10: memref<8x128xf32, #tpu.memory_space<vmem>>, %arg11: memref<8x128xf32, #tpu.memory_space<vmem>>) attributes {dimension_semantics = [], scalar_prefetch = 0 : i64, scratch_operands = 0 : i64, tpu.core_type = #tpu.core_type<tc>} {
    %c0 = arith.constant 0 : index
    %0 = memref.load %arg0[%c0] : memref<2xi32, #tpu.memory_space<smem>>
    %c0_i32 = arith.constant 0 : i32
    %1 = arith.cmpi ne, %0, %c0_i32 : i32
    %2 = arith.extui %1 : i1 to i32
    %3 = arith.sitofp %2 : i32 to f32
    %c1 = arith.constant 1 : index
    %4 = memref.load %arg0[%c1] : memref<2xi32, #tpu.memory_space<smem>>
    %c0_i32_0 = arith.constant 0 : i32
    %5 = arith.cmpi ne, %4, %c0_i32_0 : i32
    %6 = arith.extui %5 : i1 to i32
    %7 = arith.sitofp %6 : i32 to f32
    %c0_1 = arith.constant 0 : index
    %c0_2 = arith.constant 0 : index
    %8 = vector.load %arg1[%c0_1, %c0_2] : memref<36x128xf32, #tpu.memory_space<vmem>>, vector<34x128xf32>
    %c1_3 = arith.constant 1 : index
    %c0_4 = arith.constant 0 : index
    %9 = vector.load %arg1[%c1_3, %c0_4] : memref<36x128xf32, #tpu.memory_space<vmem>>, vector<34x128xf32>
    %c2 = arith.constant 2 : index
    %c0_5 = arith.constant 0 : index
    %10 = vector.load %arg1[%c2, %c0_5] : memref<36x128xf32, #tpu.memory_space<vmem>>, vector<34x128xf32>
    %11 = tpu.concatenate %8, %9, %10 in 1 : vector<34x128xf32>, vector<34x128xf32>, vector<34x128xf32> -> vector<34x384xf32>
    %12 = arith.truncf %11 : vector<34x384xf32> to vector<34x384xbf16>
    %c0_6 = arith.constant 0 : index
    %c0_7 = arith.constant 0 : index
    %13 = vector.load %arg2[%c0_6, %c0_7] : memref<384x128xbf16, #tpu.memory_space<vmem>>, vector<384x128xbf16>
    %cst = arith.constant dense<0.000000e+00> : vector<34x128xf32>
    %14 = tpu.matmul %12, %13, %cst {dimension_numbers = #tpu.dot_dimension_numbers<[1], [0], [0], [1], [0, 0, 1, 1], [], []>} : vector<34x384xbf16>, vector<384x128xbf16>, vector<34x128xf32> -> vector<34x128xf32>
    %c0_8 = arith.constant 0 : index
    %c0_9 = arith.constant 0 : index
    %15 = vector.load %arg3[%c0_8, %c0_9] : memref<1x128xf32, #tpu.memory_space<vmem>>, vector<1x128xf32>
    %16 = vector.broadcast %15 : vector<1x128xf32> to vector<34x128xf32>
    %17 = arith.addf %14, %16 : vector<34x128xf32>
    %cst_10 = arith.constant 0.000000e+00 : f32
    %18 = vector.broadcast %cst_10 : f32 to vector<34x128xf32>
    %19 = arith.maximumf %17, %18 : vector<34x128xf32>
    %c0_11 = arith.constant 0 : index
    %c0_12 = arith.constant 0 : index
    %20 = vector.load %arg4[%c0_11, %c0_12] : memref<8x34xbf16, #tpu.memory_space<vmem>>, vector<8x34xbf16>
    %21 = arith.truncf %19 : vector<34x128xf32> to vector<34x128xbf16>
    %cst_13 = arith.constant dense<0.000000e+00> : vector<8x128xf32>
    %22 = tpu.matmul %20, %21, %cst_13 {dimension_numbers = #tpu.dot_dimension_numbers<[1], [0], [0], [1], [0, 0, 1, 1], [], []>} : vector<8x34xbf16>, vector<34x128xbf16>, vector<8x128xf32> -> vector<8x128xf32>
    %23 = arith.truncf %22 : vector<8x128xf32> to vector<8x128xbf16>
    %c0_14 = arith.constant 0 : index
    %c0_15 = arith.constant 0 : index
    %24 = vector.load %arg5[%c0_14, %c0_15] : memref<128x128xbf16, #tpu.memory_space<vmem>>, vector<128x128xbf16>
    %cst_16 = arith.constant dense<0.000000e+00> : vector<8x128xf32>
    %25 = tpu.matmul %23, %24, %cst_16 {dimension_numbers = #tpu.dot_dimension_numbers<[1], [0], [0], [1], [0, 0, 1, 1], [], []>} : vector<8x128xbf16>, vector<128x128xbf16>, vector<8x128xf32> -> vector<8x128xf32>
    %c0_17 = arith.constant 0 : index
    %c0_18 = arith.constant 0 : index
    %26 = vector.load %arg6[%c0_17, %c0_18] : memref<1x128xf32, #tpu.memory_space<vmem>>, vector<1x128xf32>
    %27 = vector.broadcast %26 : vector<1x128xf32> to vector<8x128xf32>
    %28 = arith.addf %25, %27 : vector<8x128xf32>
    %29 = arith.negf %28 : vector<8x128xf32>
    %30 = math.exp %29 : vector<8x128xf32>
    %cst_19 = arith.constant 1.000000e+00 : f32
    %31 = vector.broadcast %cst_19 : f32 to vector<8x128xf32>
    %32 = arith.addf %31, %30 : vector<8x128xf32>
    %33 = arith.divf %31, %32 : vector<8x128xf32>
    %c0_20 = arith.constant 0 : index
    %c0_21 = arith.constant 0 : index
    %34 = vector.load %arg9[%c0_20, %c0_21] : memref<1x128xf32, #tpu.memory_space<vmem>>, vector<1x128xf32>
    %cst_22 = arith.constant 5.000000e-01 : f32
    %35 = vector.broadcast %cst_22 : f32 to vector<8x128xf32>
    %36 = arith.cmpf ogt, %33, %35 : vector<8x128xf32>
    %37 = arith.extui %36 : vector<8x128xi1> to vector<8x128xi32>
    %38 = arith.sitofp %37 : vector<8x128xi32> to vector<8x128xf32>
    %cst_23 = arith.constant 1.000000e+00 : f32
    %39 = vector.broadcast %cst_23 : f32 to vector<1x128xf32>
    %40 = arith.subf %39, %34 : vector<1x128xf32>
    %41 = vector.broadcast %40 : vector<1x128xf32> to vector<8x128xf32>
    %42 = arith.mulf %33, %41 : vector<8x128xf32>
    %43 = vector.broadcast %3 : f32 to vector<8x128xf32>
    %44 = arith.mulf %43, %33 : vector<8x128xf32>
    %cst_24 = arith.constant 1.000000e+00 : f32
    %45 = arith.subf %cst_24, %3 : f32
    %46 = vector.broadcast %45 : f32 to vector<8x128xf32>
    %47 = arith.mulf %46, %42 : vector<8x128xf32>
    %48 = arith.addf %44, %47 : vector<8x128xf32>
    %49 = vector.broadcast %3 : f32 to vector<8x128xf32>
    %50 = arith.mulf %49, %33 : vector<8x128xf32>
    %51 = vector.broadcast %34 : vector<1x128xf32> to vector<8x128xf32>
    %52 = arith.mulf %51, %50 : vector<8x128xf32>
    %cst_25 = arith.constant 1.000000e+00 : f32
    %53 = vector.broadcast %cst_25 : f32 to vector<1x128xf32>
    %54 = arith.subf %53, %34 : vector<1x128xf32>
    %55 = vector.broadcast %54 : vector<1x128xf32> to vector<8x128xf32>
    %56 = arith.mulf %55, %38 : vector<8x128xf32>
    %57 = arith.addf %52, %56 : vector<8x128xf32>
    %58 = vector.broadcast %7 : f32 to vector<8x128xf32>
    %59 = arith.mulf %58, %57 : vector<8x128xf32>
    %cst_26 = arith.constant 1.000000e+00 : f32
    %60 = arith.subf %cst_26, %7 : f32
    %61 = vector.broadcast %60 : f32 to vector<8x128xf32>
    %62 = arith.mulf %61, %48 : vector<8x128xf32>
    %63 = arith.addf %59, %62 : vector<8x128xf32>
    %c0_27 = arith.constant 0 : index
    %c0_28 = arith.constant 0 : index
    %64 = vector.load %arg10[%c0_27, %c0_28] : memref<8x128xf32, #tpu.memory_space<vmem>>, vector<8x128xf32>
    tpu.vector_store %arg10[%c0_27, %c0_28], %48 {strides = array<i32>} : memref<8x128xf32, #tpu.memory_space<vmem>>, vector<8x128xf32>,
    %65 = arith.truncf %63 : vector<8x128xf32> to vector<8x128xbf16>
    %c0_29 = arith.constant 0 : index
    %c0_30 = arith.constant 0 : index
    %66 = vector.load %arg7[%c0_29, %c0_30] : memref<128x128xbf16, #tpu.memory_space<vmem>>, vector<128x128xbf16>
    %cst_31 = arith.constant dense<0.000000e+00> : vector<8x128xf32>
    %67 = tpu.matmul %65, %66, %cst_31 {dimension_numbers = #tpu.dot_dimension_numbers<[1], [0], [0], [1], [0, 0, 1, 1], [], []>} : vector<8x128xbf16>, vector<128x128xbf16>, vector<8x128xf32> -> vector<8x128xf32>
    %c0_32 = arith.constant 0 : index
    %c0_33 = arith.constant 0 : index
    %68 = vector.load %arg8[%c0_32, %c0_33] : memref<1x128xf32, #tpu.memory_space<vmem>>, vector<1x128xf32>
    %69 = vector.broadcast %68 : vector<1x128xf32> to vector<8x128xf32>
    %70 = arith.addf %67, %69 : vector<8x128xf32>
    %c0_34 = arith.constant 0 : index
    %c0_35 = arith.constant 0 : index
    %71 = vector.load %arg11[%c0_34, %c0_35] : memref<8x128xf32, #tpu.memory_space<vmem>>, vector<8x128xf32>
    tpu.vector_store %arg11[%c0_34, %c0_35], %70 {strides = array<i32>} : memref<8x128xf32, #tpu.memory_space<vmem>>, vector<8x128xf32>,
    return
  }
}

</mosaic_0001>

<bundles_post_ra>
// kernel: forward.1
= control target key start
LH: loop header
LB: loop body
LE: loop exit
PB: predicated region body
PF: predicated region fallthrough
CT: control target
= control target key end

     0   :  { %17 = vsyncpa [#allocation3], 0  ;;  %s1270_s0 = inlined_call_operand.vmem [shape: s32[2], index: 0, kind: input, shape index: {}]   ;;  %s1271_s1 = inlined_call_operand.vmem [shape: f32[36,128], index: 1, kind: input, shape index: {}]   ;;  %s1272_s2 = inlined_call_operand.vmem [shape: bf16[384,128], index: 2, kind: input, shape index: {}]   ;;  %s1273_s3 = inlined_call_operand.vmem [shape: f32[1,128], index: 3, kind: input, shape index: {}]   ;;  %s1274_s4 = inlined_call_operand.vmem [shape: bf16[8,34], index: 4, kind: input, shape index: {}]   ;;  %s1275_s5 = inlined_call_operand.vmem [shape: bf16[128,128], index: 5, kind: input, shape index: {}]   ;;  %s1276_s6 = inlined_call_operand.vmem [shape: f32[1,128], index: 6, kind: input, shape index: {}]   ;;  %s1277_s7 = inlined_call_operand.vmem [shape: bf16[128,128], index: 7, kind: input, shape index: {}]   ;;  %s1278_s8 = inlined_call_operand.vmem [shape: f32[1,128], index: 8, kind: input, shape index: {}]   ;;  %s1279_s9 = inlined_call_operand.vmem [shape: f32[1,128], index: 9, kind: input, shape index: {}]   ;;  %s1280_s10 = inlined_call_operand.vmem [shape: f32[8,128], index: 10, kind: output, shape index: {0}]   ;;  %s1281_s11 = inlined_call_operand.vmem [shape: f32[8,128], index: 11, kind: output, shape index: {1}]  }
   0x1   :  { %s24_s19 = sshll.u32 %s1270_s0, 4  ;;  %s25_s19 = int_to_ptr.vmem [resolvable:$true] %s24_s19 }
   0x2   :  { %s964_s20 = scalar_lea.vmem %s25_s19, 16  ;;  %p969_p1 = scmp.lt.s32.totalorder %s25_s19, %s25_s19 }
   0x3   :  { %p965_p0 = scmp.ne.s32.totalorder %s25_s19, %s964_s20  ;;  %p970_p2 = scmp.lt.s32.totalorder %s964_s20, %s964_s20 }
   0x5   :  { %p971_p3 = por %p970_p2, %p969_p1 }
   0x7   :  { %p972_p4 = pnand %p971_p3, %p965_p0 }
   0x9   :  { %975 = shalt.err (!%p972_p4)
}
   0xa   :  { %s978_s21 = smov [#allocation2]  }
   0xb   :  { %27 = dma.vmem_to_smem %s25_s19, 16, %s978_s21, [#allocation3]  }
   0xc   :  { %976 = dma.done.wait [#allocation3], 16  }
   0xd   :  { %977 = vsyncadd [#allocation3], 4294967280 }
   0xe   :  { %49 = sfence }
   0xf   :  { %v920_v0 = vld [vmem:[%s1272_s2 + $0x78] sm:$0xff]   ;;  %v979_v1 = vmov 0.0   ;;  %vm980_vm0 = vmmov 0   ;;  %v923_v4 = vld [vmem:[%s1272_s2 + $0x70] sm:$0xff]   ;;  %v926_v7 = vld [vmem:[%s1272_s2 + $0x68] sm:$0xff]   ;;  %vm407_vm1 = vcmask 1040384  }
  0x10   :  { %839 = vmatprep.subr.bf16.mxu1 %v979_v1  ;;  %v921_v2 = vld [vmem:[%s1272_s2 + $0x38] sm:$0xff]   ;;  %772 = vmatprep.subr.bf16.mxu0 %v920_v0  ;;  %v924_v5 = vld [vmem:[%s1272_s2 + $0x30] sm:$0xff]   ;;  %v927_v8 = vld [vmem:[%s1272_s2 + $0x28] sm:$0xff]   ;;  %vm403_vm2 = vcmask 277504   ;;  %s51_s29 = sld [smem:[#allocation2]] }
  0x11   :  { %v922_v3 = vld [vmem:[%s1272_s2 + $0xb8] sm:$0xff]   ;;  %855 = vmatprep.mubr.msk.bf16.mxu1 %vm980_vm0, %v979_v1  ;;  %773 = vmatpush3.bf16.msra.mxu0 %v921_v2  ;;  %v925_v6 = vld [vmem:[%s1272_s2 + $0xb0] sm:$0xff]   ;;  %v928_v9 = vld [vmem:[%s1272_s2 + $0xa8] sm:$0xff]   ;;  %s725_s30 = sld [smem:[#allocation2 + $0x1]] }
  0x12   :  { %840 = vmatpush3.bf16.msra.mxu1 %v922_v3  ;;  %774 = vmatprep.subr.bf16.mxu0 %v923_v4  ;;  %v929_v10 = vld [vmem:[%s1272_s2 + $0x60] sm:$0xff]   ;;  %v932_v13 = vld [vmem:[%s1272_s2 + $0x58] sm:$0xff]   ;;  %v935_v16 = vld [vmem:[%s1272_s2 + $0x50] sm:$0xff]  }
  0x13   :  { %841 = vmatprep.subr.bf16.mxu1 %v979_v1  ;;  %v930_v11 = vld [vmem:[%s1272_s2 + $0x20] sm:$0xff]   ;;  %v933_v14 = vld [vmem:[%s1272_s2 + $0x18] sm:$0xff]   ;;  %v936_v17 = vld [vmem:[%s1272_s2 + $0x10] sm:$0xff]  }
  0x14   :  { %v931_v12 = vld [vmem:[%s1272_s2 + $0xa0] sm:$0xff]   ;;  %v934_v15 = vld [vmem:[%s1272_s2 + $0x98] sm:$0xff]   ;;  %v937_v18 = vld [vmem:[%s1272_s2 + $0x90] sm:$0xff]  }
  0x15   :  { %775 = vmatpush3.bf16.msra.mxu0 %v924_v5  ;;  %v938_v19 = vld [vmem:[%s1272_s2 + $0x48] sm:$0xff]   ;;  %v941_v22 = vld [vmem:[%s1272_s2 + $0x40] sm:$0xff]   ;;  %v66_v32 = vld [vmem:[%s1271_s1 + $0x11] sm:$0xff] }
  0x16   :  { %842 = vmatpush3.bf16.msra.mxu1 %v925_v6  ;;  %776 = vmatprep.subr.bf16.mxu0 %v926_v7  ;;  %v939_v20 = vld [vmem:[%s1272_s2 + $0x8] sm:$0xff]   ;;  %v942_v26 = vld [vmem:[%s1272_s2] sm:$0xff]   ;;  %v61_v37 = vld [vmem:[%s1271_s1 + $0x10] sm:$0xff]  ;;  %p52_p5 = scmp.ne.s32.totalorder %s51_s29, 0 }
  0x17   :  { %843 = vmatprep.subr.bf16.mxu1 %v979_v1  ;;  %v940_v21 = vld [vmem:[%s1272_s2 + $0x88] sm:$0xff]   ;;  %v943_v27 = vld [vmem:[%s1272_s2 + $0x80] sm:$0xff]   ;;  %v62_v38 = vld [vmem:[%s1271_s1 + $0x18] sm:$0xff]  ;;  %p56_p6 = scmp.ne.s32.totalorder %s725_s30, 0 }
  0x18   :  { %v64_v23 = vld [vmem:[%s1271_s1 + $0x1] sm:$0xff]  ;;  %v65_v24 = vld [vmem:[%s1271_s1 + $0x9] sm:$0xff]  ;;  %v67_v33 = vld [vmem:[%s1271_s1 + $0x19] sm:$0xff]  ;;  %v77_v42 = vpack.c.bf16 %v62_v38, %v61_v37 }
  0x19   :  { %777 = vmatpush3.bf16.msra.mxu0 %v927_v8  ;;  %v75_v25 = vpack.c.bf16 %v65_v24, %v64_v23  ;;  %v59_v28 = vld [vmem:[%s1271_s1] sm:$0xff]  ;;  %v60_v29 = vld [vmem:[%s1271_s1 + $0x8] sm:$0xff]  ;;  %v78_v36 = vpack.c.bf16 %v67_v33, %v66_v32  ;;  %v71_v39 = vld [vmem:[%s1271_s1 + $0x12] sm:$0xff] }
  0x1a   :  { %844 = vmatpush3.bf16.msra.mxu1 %v928_v9  ;;  %778 = vmatprep.subr.bf16.mxu0 %v929_v10  ;;  %v69_v30 = vld [vmem:[%s1271_s1 + $0x2] sm:$0xff]  ;;  %v70_v31 = vld [vmem:[%s1271_s1 + $0xa] sm:$0xff]  ;;  %v74_v34 = vpack.c.bf16 %v60_v29, %v59_v28  ;;  %v72_v40 = vld [vmem:[%s1271_s1 + $0x1a] sm:$0xff] }
  0x1b   :  { %845 = vmatprep.subr.bf16.mxu1 %v979_v1  ;;  %314 = vmatprep.mubr.bf16.mxu0 %v75_v25  ;;  %v76_v35 = vpack.c.bf16 %v70_v31, %v69_v30  ;;  %v68_v41 = vld [vmem:[%s1271_s1 + $0x21] sm:$0x3]  ;;  %v79_v43 = vpack.c.bf16 %v72_v40, %v71_v39  ;;  %v944_v49 = vld [vmem:[%s1275_s5 + $0x38] sm:$0xff]   ;;  %v945_v50 = vld [vmem:[%s1275_s5 + $0x30] sm:$0xff]  }
  0x1c   :  { %v81_v44 = vpack.c.bf16 %v68_v41, %v68_v41  ;;  %v63_v45 = vld [vmem:[%s1271_s1 + $0x20] sm:$0x3]  ;;  %v73_v46 = vld [vmem:[%s1271_s1 + $0x22] sm:$0x3]  ;;  %v946_v51 = vld [vmem:[%s1275_s5 + $0x28] sm:$0xff]  }
  0x1d   :  { %779 = vmatpush3.bf16.msra.mxu0 %v930_v11  ;;  %v80_v47 = vpack.c.bf16 %v63_v45, %v63_v45  ;;  %v82_v48 = vpack.c.bf16 %v73_v46, %v73_v46  ;;  %v947_v52 = vld [vmem:[%s1275_s5 + $0x20] sm:$0xff]   ;;  %v948_v53 = vld [vmem:[%s1275_s5 + $0x18] sm:$0xff]   ;;  %v949_v54 = vld [vmem:[%s1275_s5 + $0x10] sm:$0xff]  }
  0x1e   :  { %846 = vmatpush3.bf16.msra.mxu1 %v931_v12  ;;  %780 = vmatprep.subr.bf16.mxu0 %v932_v13  ;;  %v950_v55 = vld [vmem:[%s1275_s5 + $0x8] sm:$0xff]  }
  0x1f   :  { %847 = vmatprep.subr.bf16.mxu1 %v979_v1 }
  0x21   :  { %781 = vmatpush3.bf16.msra.mxu0 %v933_v14  ;;  %v726_v14 = vld [vmem:[%s1273_s3] ss:$0 sm:$0xff] }
  0x22   :  { %848 = vmatpush3.bf16.msra.mxu1 %v934_v15  ;;  %782 = vmatprep.subr.bf16.mxu0 %v935_v16 }
  0x23   :  { %849 = vmatprep.subr.bf16.mxu1 %v979_v1 }
  0x25   :  { %783 = vmatpush3.bf16.msra.mxu0 %v936_v17 }
  0x26   :  { %850 = vmatpush3.bf16.msra.mxu1 %v937_v18  ;;  %784 = vmatprep.subr.bf16.mxu0 %v938_v19 }
  0x27   :  { %851 = vmatprep.subr.bf16.mxu1 %v979_v1 }
  0x29   :  { %785 = vmatpush3.bf16.msra.mxu0 %v939_v20 }
  0x2a   :  { %852 = vmatpush3.bf16.msra.mxu1 %v940_v21  ;;  %786 = vmatprep.subr.bf16.mxu0 %v941_v22 }
  0x2b   :  { %853 = vmatprep.subr.bf16.mxu1 %v979_v1 }
  0x2d   :  { %787 = vmatpush3.bf16.msra.mxu0 %v942_v26 }
  0x2e   :  { %854 = vmatpush3.bf16.msra.mxu1 %v943_v27  ;;  %867 = vmatprep.subr.bf16.mxu0 %v979_v1 }
  0x2f   :  { %877 = vmatprep.subr.bf16.mxu1 %v979_v1 }
  0x30   :  { %315 = vmatmul.mubr.bf16.vlgmr.msra.gmra.mxu0 %v74_v34 }
  0x31   :  { %856 = vmatmul.mubr.bf16.vlgmr.msra.gmra.mxu1 %v76_v35  ;;  %322 = vmatprep.mubr.bf16.mxu0 %v78_v36 }
  0x32   :  { %859 = vmatprep.mubr.msk.bf16.mxu1 %vm980_vm0, %v979_v1  ;;  %878 = vmatpush3.bf16.msra.mxu1 %v944_v49  ;;  %v952_v49 = vld [vmem:[%s1277_s7 + $0x38] sm:$0xff]  }
  0x33   :  { %879 = vmatprep.subr.bf16.mxu1 %v979_v1 }
  0x36   :  { %880 = vmatpush3.bf16.msra.mxu1 %v945_v50  ;;  %v953_v50 = vld [vmem:[%s1277_s7 + $0x30] sm:$0xff]  }
  0x37   :  { %881 = vmatprep.subr.bf16.mxu1 %v979_v1 }
  0x38   :  { %323 = vmatmul.mubr.bf16.gmra.mxu0 %v77_v42  ;;  %v399_v42 = vld [vmem:[%s1274_s4] sm:$0xf] }
  0x39   :  { %860 = vmatmul.mubr.bf16.gmra.mxu1 %v79_v43  ;;  %330 = vmatprep.mubr.bf16.mxu0 %v81_v44  ;;  %v951_v43 = vld [vmem:[%s1275_s5] sm:$0xff]  }
  0x3a   :  { %863 = vmatprep.mubr.msk.bf16.mxu1 %vm980_vm0, %v979_v1  ;;  %882 = vmatpush3.bf16.msra.mxu1 %v946_v51  ;;  %v954_v51 = vld [vmem:[%s1277_s7 + $0x28] sm:$0xff]  }
  0x3b   :  { %883 = vmatprep.subr.bf16.mxu1 %v979_v1 }
  0x3e   :  { %884 = vmatpush3.bf16.msra.mxu1 %v947_v52  ;;  %v955_v52 = vld [vmem:[%s1277_s7 + $0x20] sm:$0xff]  }
  0x3f   :  { %885 = vmatprep.subr.bf16.mxu1 %v979_v1 }
  0x40   :  { %331 = vmatmul.mubr.bf16.gmra.mxu0 %v80_v47 }
  0x41   :  { %864 = vmatmul.mubr.bf16.gmra.mxu1 %v82_v48  ;;  %873 = vmatprep.mubr.msk.bf16.mxu0 %vm980_vm0, %v979_v1 }
  0x42   :  { %893 = vmatprep.mubr.msk.bf16.mxu1 %vm980_vm0, %v979_v1  ;;  %886 = vmatpush3.bf16.msra.mxu1 %v948_v53  ;;  %v956_v53 = vld [vmem:[%s1277_s7 + $0x18] sm:$0xff]  }
  0x43   :  { %887 = vmatprep.subr.bf16.mxu1 %v979_v1 }
  0x46   :  { %888 = vmatpush3.bf16.msra.mxu1 %v949_v54  ;;  %v957_v54 = vld [vmem:[%s1277_s7 + $0x10] sm:$0xff]  }
  0x47   :  { %889 = vmatprep.subr.bf16.mxu1 %v979_v1 }
  0x4a   :  { %890 = vmatpush3.bf16.msra.mxu1 %v950_v55  ;;  %v958_v55 = vld [vmem:[%s1277_s7 + $0x8] sm:$0xff]  }
  0x4b   :  { %891 = vmatprep.subr.bf16.mxu1 %v979_v1 }
  0x4e   :  { %892 = vmatpush3.bf16.msra.mxu1 %v951_v43 }
  0xf0   :  { %v788_v56 = vpop.f32.mrf.mxu0 }
  0xf1   :  { %v372_v57 = vpop.f32.mrf.mxu1 }
  0xf2   :  { %v789_v58 = vpop.f32.mrf.mxu0 }
  0xf3   :  { %v857_v59 = vpop.f32.mrf.mxu1  ;;  %v790_v22 = vadd.f32 %v789_v58, %v788_v56  ;;  %v959_v56 = vld [vmem:[%s1277_s7] sm:$0xff]   ;;  %s53_s7 = scalar_select %p52_p5, 1, 0 }
  0xf4   :  { %v791_v60 = vpop.f32.mrf.mxu0 }
  0xf5   :  { %v375_v61 = vpop.f32.mrf.mxu1  ;;  %v317_v30 = vadd.f32 %v790_v22, %v726_v14  ;;  %s54_s13 = scvt.s32.f32 %s53_s7 }
  0xf6   :  { %v792_v62 = vpop.f32.mrf.mxu0 }
  0xf7   :  { %v858_v63 = vpop.f32.mrf.mxu1  ;;  %v793_v17 = vadd.f32 %v792_v62, %v791_v60  ;;  %v373_v36 = vadd.f32 %v372_v57, %v317_v30  ;;  %v752_v57 = vld [vmem:[%s1276_s6] ss:$0 sm:$0xff]  ;;  %s57_s6 = scalar_select %p56_p6, 1, 0 }
  0xf8   :  { %v794_v0 = vpop.f32.mrf.mxu0  ;;  %s583_s15 = ssub.f32 1.0, %s54_s13 }
  0xf9   :  { %v380_v2 = vpop.f32.mrf.mxu1  ;;  %v320_v27 = vadd.f32 %v793_v17, %v726_v14  ;;  %v394_v40 = vmax.f32 %v373_v36, 0.0  ;;  %s58_s14 = scvt.s32.f32 %s57_s6 }
  0xfa   :  { %v795_v3 = vpop.f32.mrf.mxu0 }
  0xfb   :  { %v861_v4 = vpop.f32.mrf.mxu1  ;;  %v796_v12 = vadd.f32 %v795_v3, %v794_v0  ;;  %v376_v33 = vadd.f32 %v375_v61, %v320_v27  ;;  %v575_v3 = vlaneseq  ;;  %s598_s16 = ssub.f32 1.0, %s58_s14 }
  0xfc   :  { %v797_v5 = vpop.f32.mrf.mxu0 }
  0xfd   :  { %v383_v6 = vpop.f32.mrf.mxu1  ;;  %v325_v23 = vadd.f32 %v796_v12, %v726_v14  ;;  %v395_v38 = vmax.f32 %v376_v33, 0.0  ;;  %v576_v4 = vshrl.u32 %v575_v3, 7  ;;  %v584_v12 = vstv %s583_s15 }
  0xfe   :  { %v798_v7 = vpop.f32.mrf.mxu0 }
  0xff   :  { %v862_v8 = vpop.f32.mrf.mxu1  ;;  %v799_v9 = vadd.f32 %v798_v7, %v797_v5  ;;  %v381_v31 = vadd.f32 %v380_v2, %v325_v23  ;;  %v400_v41 = vpack.c.bf16 %v395_v38, %v394_v40  ;;  %v569_v5 = vld [vmem:[%s1279_s9] sm:$0x1]  ;;  %v577_v7 = vsub.s32 0, %v576_v4 }
 0x100   :  { %v800_v10 = vpop.f32.mrf.mxu0 }
 0x101   :  { %v388_v11 = vpop.f32.mrf.mxu1  ;;  %v328_v18 = vadd.f32 %v799_v9, %v726_v14  ;;  %v396_v37 = vmax.f32 %v381_v31, 0.0  ;;  %v581_v9 = vstv %s54_s13 }
 0x102   :  { %v801_v13 = vpop.f32.mrf.mxu0 }
 0x103   :  { %v802_v15 = vadd.f32 %v801_v13, %v800_v10  ;;  %v865_v16 = vpop.f32.mrf.mxu1  ;;  %v384_v28 = vadd.f32 %v383_v6, %v328_v18  ;;  %v573_v6 = vsub.f32 1.0, %v569_v5  ;;  %v591_v10 = vrot.slane %v569_v5, %v577_v7 }
 0x104   :  { %v803_v19 = vpop.f32.mrf.mxu0 }
 0x105   :  { %v333_v20 = vadd.f32 %v802_v15, %v726_v14  ;;  %v391_v21 = vpop.f32.mrf.mxu1  ;;  %v397_v34 = vmax.f32 %v384_v28, 0.0  ;;  %v578_v8 = vrot.slane %v573_v6, %v577_v7  ;;  %v596_v19 = vstv %s58_s14 }
 0x106   :  { %v804_v24 = vpop.f32.mrf.mxu0 }
 0x107   :  { %v389_v25 = vadd.f32 %v388_v11, %v333_v20  ;;  %v866_v26 = vpop.f32.mrf.mxu1  ;;  %v401_v39 = vpack.c.bf16 %v397_v34, %v396_v37  ;;  %v599_v20 = vstv %s598_s16 }
 0x109   :  { %v398_v29 = vmax.f32 %v389_v25, 0.0 }
 0x10b   :  { %v402_v32 = vpack.c.bf16 %v398_v29, %v398_v29 }
 0x10d   :  { %v409_v35 = vsel %vm407_vm1, %v402_v32, 0 }
 0x10e   :  { %868 = vmatpush3.bf16.msra.mxu0 %v409_v35 }
 0x10f   :  { %869 = vmatprep.subr.bf16.mxu0 %v979_v1 }
 0x112   :  { %870 = vmatpush3.bf16.msra.mxu0 %v401_v39 }
 0x113   :  { %871 = vmatprep.subr.bf16.mxu0 %v979_v1 }
 0x116   :  { %872 = vmatpush3.bf16.msra.mxu0 %v400_v41 }
 0x117   :  { %897 = vmatprep.subr.bf16.mxu0 %v979_v1 }
 0x119   :  { %874 = vmatmul.mubr.msk.bf16.vlgmr.msra.gmra.mxu0 %vm403_vm2, %v399_v42 }
 0x11a   :  { %913 = vmatprep.mubr.msk.bf16.mxu0 %vm980_vm0, %v979_v1  ;;  %898 = vmatpush3.bf16.msra.mxu0 %v952_v49 }
 0x11b   :  { %899 = vmatprep.subr.bf16.mxu0 %v979_v1 }
 0x11e   :  { %900 = vmatpush3.bf16.msra.mxu0 %v953_v50 }
 0x11f   :  { %901 = vmatprep.subr.bf16.mxu0 %v979_v1 }
 0x122   :  { %902 = vmatpush3.bf16.msra.mxu0 %v954_v51 }
 0x123   :  { %903 = vmatprep.subr.bf16.mxu0 %v979_v1 }
 0x126   :  { %904 = vmatpush3.bf16.msra.mxu0 %v955_v52 }
 0x127   :  { %905 = vmatprep.subr.bf16.mxu0 %v979_v1 }
 0x12a   :  { %906 = vmatpush3.bf16.msra.mxu0 %v956_v53 }
 0x12b   :  { %907 = vmatprep.subr.bf16.mxu0 %v979_v1 }
 0x12e   :  { %908 = vmatpush3.bf16.msra.mxu0 %v957_v54 }
 0x12f   :  { %909 = vmatprep.subr.bf16.mxu0 %v979_v1 }
 0x132   :  { %910 = vmatpush3.bf16.msra.mxu0 %v958_v55 }
 0x133   :  { %911 = vmatprep.subr.bf16.mxu0 %v979_v1 }
 0x136   :  { %912 = vmatpush3.bf16.msra.mxu0 %v959_v56 }
 0x1d9   :  { %v445_v44 = vpop.f32.mrf.mxu0 }
 0x1da   :  { %v451_v45 = vpack.c.bf16 %v445_v44, %v445_v44 }
 0x1db   :  { %v875_v46 = vpop.f32.mrf.mxu0 }
 0x1dc   :  { %894 = vmatmul.mubr.bf16.vlgmr.msra.gmra.mxu1 %v451_v45 }
 0x1dd   :  { %v448_v47 = vpop.f32.mrf.mxu0 }
 0x1df   :  { %v876_v48 = vpop.f32.mrf.mxu0 }
 0x29c   :  { %v557_v58 = vpop.f32.mrf.mxu1 }
 0x29d   :  { %v558_v59 = vadd.f32 %v752_v57, %v557_v58 }
 0x29e   :  { %v895_v60 = vpop.f32.mrf.mxu1 }
 0x29f   :  { %v761_v61 = vmul.f32 -1.442695, %v558_v59 }
 0x2a0   :  { %v560_v62 = vpop.f32.mrf.mxu1 }
 0x2a1   :  { %960 = vpow2.f32 %v761_v61 }
 0x2a2   :  { %v896_v63 = vpop.f32.mrf.mxu1 }
 0x2ae   :  { %v961_v0 = vpop.eup %960 }
 0x2af   :  { %v566_v2 = vadd.f32 1.0, %v961_v0 }
 0x2b1   :  { %962 = vrcp.f32 %v566_v2 }
 0x2be   :  { %v963_v11 = vpop.eup %962 }
 0x2bf   :  { %vm570_vm3 = vcmp.gt.f32.partialorder %v963_v11, 0.5  ;;  %v580_v13 = vmul.f32 %v963_v11, %v578_v8  ;;  %v582_v14 = vmul.f32 %v963_v11, %v581_v9 }
 0x2c0   :  { %v762_v15 = vsel %vm570_vm3, 1.0, %v979_v1  ;;  %v763_v1 = vld [vmem:[%s1278_s8] ss:$0 sm:$0xff] }
 0x2c1   :  { %v585_v16 = vmul.f32 %v584_v12, %v580_v13  ;;  %v593_v17 = vmul.f32 %v591_v10, %v582_v14  ;;  %v594_v18 = vmul.f32 %v762_v15, %v578_v8 }
 0x2c3   :  { %v586_v21 = vadd.f32 %v585_v16, %v582_v14  ;;  %v595_v22 = vadd.f32 %v594_v18, %v593_v17 }
 0x2c5   :  { %v597_v23 = vmul.f32 %v596_v19, %v595_v22  ;;  %v600_v24 = vmul.f32 %v599_v20, %v586_v21  ;;  %602 = vst [vmem:[%s1280_s10] sm:$0xff] %v586_v21 }
 0x2c7   :  { %v601_v25 = vadd.f32 %v600_v24, %v597_v23 }
 0x2c9   :  { %v603_v26 = vpack.c.bf16 %v601_v25, %v601_v25 }
 0x2cb   :  { %914 = vmatmul.mubr.bf16.vlgmr.msra.gmra.mxu0 %v603_v26 }
 0x38b   :  { %v709_v27 = vpop.f32.mrf.mxu0 }
 0x38c   :  { %v710_v28 = vadd.f32 %v763_v1, %v709_v27 }
 0x38d   :  { %v915_v29 = vpop.f32.mrf.mxu0 }
 0x38e   :  { %715 = vst [vmem:[%s1281_s11] sm:$0xff] %v710_v28 }
 0x38f   :  { %v712_v30 = vpop.f32.mrf.mxu0 }
 0x391   :  { %v916_v31 = vpop.f32.mrf.mxu0 }
 0x392   :  { %724 = vsyncpa [#allocation3], 1 }

</bundles_post_ra>
